<compile_context>
chip_gen: v5e
topology: v5e:2x2
jax: 0.10.0
libtpu: 0.0.40
codegen_flags: <defaults>
</compile_context>

<pallas_src>
import functools
import math

import jax
import jax.numpy as jnp
from jax.experimental import pallas as pl
from jax.experimental.pallas import tpu as pltpu


# ----------------------------- Pallas kernels ------------------------------


def _masked_linear_nobias_kernel(x_ref, w_ref, wm_ref, o_ref, acc_ref, *,
                                 logit_ths, compute_dtype):
    """One (tm, tn) output tile, accumulated over the K grid axis.

    effective weight = (weight_mask > logit(ths)) * weight      (== sigmoid>ths)
    y = x @ W^T  via dot_general contracting K on both operands (no transpose).
    """
    @pl.when(pl.program_id(2) == 0)
    def _():
        acc_ref[...] = jnp.zeros_like(acc_ref)

    eff_w = jnp.where(wm_ref[...] > logit_ths, w_ref[...], 0.0).astype(compute_dtype)
    x = x_ref[...].astype(compute_dtype)
    acc_ref[...] += jax.lax.dot_general(
        x, eff_w, (((1,), (1,)), ((), ())),
        preferred_element_type=jnp.float32)

    @pl.when(pl.program_id(2) == pl.num_programs(2) - 1)
    def _():
        o_ref[...] = acc_ref[...].astype(o_ref.dtype)


def _masked_linear_bias_kernel(x_ref, w_ref, wm_ref, b_ref, bm_ref, o_ref,
                               acc_ref, *, logit_ths, compute_dtype):
    @pl.when(pl.program_id(2) == 0)
    def _():
        acc_ref[...] = jnp.zeros_like(acc_ref)

    eff_w = jnp.where(wm_ref[...] > logit_ths, w_ref[...], 0.0).astype(compute_dtype)
    x = x_ref[...].astype(compute_dtype)
    acc_ref[...] += jax.lax.dot_general(
        x, eff_w, (((1,), (1,)), ((), ())),
        preferred_element_type=jnp.float32)

    @pl.when(pl.program_id(2) == pl.num_programs(2) - 1)
    def _():
        eff_b = jnp.where(bm_ref[...] > logit_ths, b_ref[...], 0.0)  # (1, tn)
        o_ref[...] = (acc_ref[...] + eff_b).astype(o_ref.dtype)


def _attention_kernel(qkv_ref, o_ref, *, scale, heads, head_dim, compute_dtype):
    """One batch per grid step, all heads processed inside the kernel.

    qkv_ref: (N, 3*D) for this batch, last axis laid out as (qkv, head, d)
             exactly like the torch rearrange 'b n (qkv h d)'.
    o_ref:   (N, D) output already in merged-head layout (lane-dense).
    """
    dim = heads * head_dim
    # One lane-dense load of the whole tile, then three (N, D) slabs; scale is
    # folded into q here (N*D multiplies instead of N*N per head).
    qkv = qkv_ref[...]
    q_all = (qkv[:, :dim].astype(jnp.float32) * scale).astype(compute_dtype)
    k_all = qkv[:, dim:2 * dim].astype(compute_dtype)
    v_all = qkv[:, 2 * dim:3 * dim].astype(compute_dtype)

    outs = []
    for h in range(heads):                       # static unroll over heads
        lo = h * head_dim
        q = q_all[:, lo:lo + head_dim]
        k = k_all[:, lo:lo + head_dim]
        v = v_all[:, lo:lo + head_dim]

        # q @ k^T without materializing a transpose (contract d on both sides)
        s = jax.lax.dot_general(q, k, (((1,), (1,)), ((), ())),
                                preferred_element_type=jnp.float32)   # (N, N)
        m = jnp.max(s, axis=-1, keepdims=True)
        e = jnp.exp(s - m)
        p = e * pl.reciprocal(jnp.sum(e, axis=-1, keepdims=True), approx=True)

        outs.append(jnp.dot(p.astype(compute_dtype), v,
                            preferred_element_type=jnp.float32))      # (N, d)

    # single lane-dense store (no per-head masked partial stores)
    o_ref[...] = jnp.concatenate(outs, axis=-1).astype(o_ref.dtype)


# ----------------------------- wrappers -------------------------------------


def _pick_tile(size, target, align):
    """Largest multiple of `align` dividing `size` and <= target, else full size
    (full-extent blocks always satisfy the (8,128) constraint)."""
    if size <= target:
        return size
    t = (target // align) * align
    while t >= align:
        if size % t == 0:
            return t
        t -= align
    return size


def masked_linear(x2d, w, w_mask, bias=None, bias_mask=None, *, ths,
                  out_dtype=jnp.float32, compute_dtype=jnp.bfloat16,
                  tm_target=256, tn_target=256, tk_target=512):
    """x2d: (M, K) ; w, w_mask: (O, K) ; bias, bias_mask: (O,) or None."""
    M, K = x2d.shape
    O, K2 = w.shape
    assert K == K2

    # sigmoid(m) > ths  <=>  m > logit(ths)   (sigmoid strictly monotone)
    if 0.0 < ths < 1.0:
        logit_ths = math.log(ths / (1.0 - ths))
    else:
        logit_ths = math.inf if ths >= 1.0 else -math.inf

    tm = _pick_tile(M, tm_target, 8)
    tn = _pick_tile(O, tn_target, 128)
    tk = _pick_tile(K, tk_target, 128)
    grid = (M // tm, O // tn, K // tk)

    x_spec = pl.BlockSpec((tm, tk), lambda i, j, k: (i, k))
    w_spec = pl.BlockSpec((tn, tk), lambda i, j, k: (j, k))
    out_spec = pl.BlockSpec((tm, tn), lambda i, j, k: (i, j))
    out_shape = jax.ShapeDtypeStruct((M, O), out_dtype)
    scratch = [pltpu.VMEM((tm, tn), jnp.float32)]
    cparams = pltpu.CompilerParams(
        dimension_semantics=("parallel", "parallel", "arbitrary"))

    if bias is None:
        kern = functools.partial(_masked_linear_nobias_kernel,
                                 logit_ths=logit_ths, compute_dtype=compute_dtype)
        return pl.pallas_call(
            kern,
            out_shape=out_shape,
            grid=grid,
            in_specs=[x_spec, w_spec, w_spec],
            out_specs=out_spec,
            scratch_shapes=scratch,
            compiler_params=cparams,
        )(x2d, w, w_mask)

    kern = functools.partial(_masked_linear_bias_kernel,
                             logit_ths=logit_ths, compute_dtype=compute_dtype)
    b_spec = pl.BlockSpec((1, tn), lambda i, j, k: (0, j))
    return pl.pallas_call(
        kern,
        out_shape=out_shape,
        grid=grid,
        in_specs=[x_spec, w_spec, w_spec, b_spec, b_spec],
        out_specs=out_spec,
        scratch_shapes=scratch,
        compiler_params=cparams,
    )(x2d, w, w_mask, bias.reshape(1, O), bias_mask.reshape(1, O))


def attention_forward(x, params, *, heads, ths=0.5, compute_dtype=jnp.bfloat16):
    """x: (B, N, D) float32 -> (B, N, D) float32."""
    b, n, dim = x.shape
    assert dim % heads == 0
    d = dim // heads
    scale = dim ** (-0.5)  # NOTE: full embed dim, exactly as the PyTorch module

    # --- to_qkv (no bias), tiled & pipelined; intermediate kept in bf16 ------
    x2d = x.reshape(b * n, dim)
    qkv = masked_linear(x2d, params["w_qkv"], params["w_qkv_mask"],
                        ths=ths, out_dtype=compute_dtype,
                        compute_dtype=compute_dtype)
    # (B*N, 3D) -> (B, N, 3D): contiguous metadata reshape, no HBM transpose.
    qkv3 = qkv.reshape(b, n, 3 * dim)

    # --- attention: one grid step per batch, all heads in-kernel,
    #     output written directly in merged-head (lane-dense) layout ----------
    out = pl.pallas_call(
        functools.partial(_attention_kernel, scale=scale, heads=heads,
                          head_dim=d, compute_dtype=compute_dtype),
        out_shape=jax.ShapeDtypeStruct((b, n, dim), compute_dtype),
        grid=(b,),
        in_specs=[pl.BlockSpec((None, n, 3 * dim), lambda i: (i, 0, 0))],
        out_specs=pl.BlockSpec((None, n, dim), lambda i: (i, 0, 0)),
        compiler_params=pltpu.CompilerParams(dimension_semantics=("parallel",)),
    )(qkv3)

    # --- output projection (bias), tiled & pipelined; final output f32 -------
    out2d = masked_linear(out.reshape(b * n, dim),
                          params["w_out"], params["w_out_mask"],
                          params["b_out"], params["b_out_mask"],
                          ths=ths, out_dtype=jnp.float32,
                          compute_dtype=compute_dtype)
    # nn.Dropout(p=0.2) is identity in eval mode; not applied.
    return out2d.reshape(b, n, dim)


# ----------------------------- reference ------------------------------------


def reference_forward(x, params, *, heads, ths=0.5):
    """Pure-JAX f32 reference mirroring the PyTorch module (eval, ths path)."""
    b, n, dim = x.shape
    d = dim // heads
    scale = dim ** (-0.5)

    gw = (jax.nn.sigmoid(params["w_qkv_mask"]) > ths).astype(jnp.float32)
    qkv = jnp.einsum("bnk,ok->bno", x, gw * params["w_qkv"])
    q, k, v = jnp.split(qkv, 3, axis=-1)

    def split_heads(t):
        return t.reshape(b, n, heads, d).transpose(0, 2, 1, 3)

    q, k, v = map(split_heads, (q, k, v))
    dots = jnp.einsum("bhid,bhjd->bhij", q, k) * scale
    attn = jax.nn.softmax(dots, axis=-1)
    out = jnp.einsum("bhij,bhjd->bhid", attn, v)
    out = out.transpose(0, 2, 1, 3).reshape(b, n, dim)

    gow = (jax.nn.sigmoid(params["w_out_mask"]) > ths).astype(jnp.float32)
    gob = (jax.nn.sigmoid(params["b_out_mask"]) > ths).astype(jnp.float32)
    return (jnp.einsum("bnk,ok->bno", out, gow * params["w_out"])
            + gob * params["b_out"])


# ----------------------------- param init -----------------------------------


def init_params(key, dim):
    """Deterministic init mirroring MaskedLinear.__init__ (training_mode='mask')."""
    k = jax.random.split(key, 6)
    c = math.e * math.sqrt(1.0 / dim)  # in_features = dim for both layers

    w_qkv = c * jax.random.rademacher(k[0], (3 * dim, dim), dtype=jnp.float32)
    w_qkv_mask = jax.random.normal(k[1], (3 * dim, dim), dtype=jnp.float32)

    w_out = c * jax.random.rademacher(k[2], (dim, dim), dtype=jnp.float32)
    w_out_mask = jax.random.normal(k[3], (dim, dim), dtype=jnp.float32)
    b_out = c * jax.random.rademacher(k[4], (dim,), dtype=jnp.float32)
    b_out_mask = jax.random.normal(k[5], (dim,), dtype=jnp.float32)

    return dict(
        w_qkv=w_qkv,
        w_qkv_mask=w_qkv_mask,
        w_out=w_out,
        w_out_mask=w_out_mask,
        b_out=b_out,
        b_out_mask=b_out_mask,
    )


# ----------------------------- main ------------------------------------------

if __name__ == "__main__":
    B, N, DIM, HEADS = 2, 8, 32, 8

    key = jax.random.PRNGKey(0)
    key_x, key_p = jax.random.split(key)
    x = jax.random.normal(key_x, (B, N, DIM), dtype=jnp.float32)
    params = init_params(key_p, DIM)

    fwd = jax.jit(functools.partial(attention_forward, heads=HEADS, ths=0.5))
    y = fwd(x, params)
    jax.block_until_ready(y)

    assert y.shape == (B, N, DIM)
    assert jnp.all(jnp.isfinite(y))

    # correctness vs. pure-JAX f32 reference (bf16 MXU compute -> loose L2 tol)
    y_ref = reference_forward(x, params, heads=HEADS, ths=0.5)
    rel_err = jnp.linalg.norm(y - y_ref) / (jnp.linalg.norm(y_ref) + 1e-6)
    assert float(rel_err) < 5e-2

    print("KERNEL_OK")
</pallas_src>

<mosaic_0001>
module attributes {stable_mosaic.version = 11 : i64} {
  func.func @_masked_linear_nobias_kernel(%arg0: i32, %arg1: i32, %arg2: i32, %arg3: memref<16x32xf32, #tpu.memory_space<vmem>>, %arg4: memref<96x32xf32, #tpu.memory_space<vmem>>, %arg5: memref<96x32xf32, #tpu.memory_space<vmem>>, %arg6: memref<16x96xbf16, #tpu.memory_space<vmem>>, %arg7: memref<16x96xf32, #tpu.memory_space<vmem>>) attributes {dimension_semantics = [#tpu.dimension_semantics<parallel>, #tpu.dimension_semantics<parallel>, #tpu.dimension_semantics<arbitrary>], iteration_bounds = array<i64: 1, 1, 1>, scalar_prefetch = 0 : i64, scratch_operands = 1 : i64, tpu.core_type = #tpu.core_type<tc>, window_params = [{transform_indices = @transform_0, window_bounds = array<i64: 16, 32>}, {transform_indices = @transform_1, window_bounds = array<i64: 96, 32>}, {transform_indices = @transform_2, window_bounds = array<i64: 96, 32>}, {transform_indices = @transform_3, window_bounds = array<i64: 16, 96>}]} {
    %c0_i32 = arith.constant 0 : i32
    %0 = arith.cmpi eq, %arg2, %c0_i32 : i32
    %1 = arith.extui %0 : i1 to i32
    %c0_i32_0 = arith.constant 0 : i32
    %2 = arith.cmpi ne, %1, %c0_i32_0 : i32
    scf.if %2 {
      %cst_14 = arith.constant 0.000000e+00 : f32
      %19 = vector.broadcast %cst_14 : f32 to vector<16x96xf32>
      %c0_15 = arith.constant 0 : index
      %c0_16 = arith.constant 0 : index
      %20 = vector.load %arg7[%c0_15, %c0_16] : memref<16x96xf32, #tpu.memory_space<vmem>>, vector<16x96xf32>
      tpu.vector_store %arg7[%c0_15, %c0_16], %19 {strides = array<i32>} : memref<16x96xf32, #tpu.memory_space<vmem>>, vector<16x96xf32>,
    } else {
    }
    %c0 = arith.constant 0 : index
    %c0_1 = arith.constant 0 : index
    %3 = vector.load %arg5[%c0, %c0_1] : memref<96x32xf32, #tpu.memory_space<vmem>>, vector<96x32xf32>
    %cst = arith.constant 0.000000e+00 : f32
    %4 = vector.broadcast %cst : f32 to vector<96x32xf32>
    %5 = arith.cmpf ogt, %3, %4 : vector<96x32xf32>
    %c0_2 = arith.constant 0 : index
    %c0_3 = arith.constant 0 : index
    %6 = vector.load %arg4[%c0_2, %c0_3] : memref<96x32xf32, #tpu.memory_space<vmem>>, vector<96x32xf32>
    %cst_4 = arith.constant 0.000000e+00 : f32
    %7 = vector.broadcast %cst_4 : f32 to vector<96x32xf32>
    %8 = arith.select %5, %6, %7 : vector<96x32xi1>, vector<96x32xf32>
    %9 = arith.truncf %8 : vector<96x32xf32> to vector<96x32xbf16>
    %c0_5 = arith.constant 0 : index
    %c0_6 = arith.constant 0 : index
    %10 = vector.load %arg3[%c0_5, %c0_6] : memref<16x32xf32, #tpu.memory_space<vmem>>, vector<16x32xf32>
    %11 = arith.truncf %10 : vector<16x32xf32> to vector<16x32xbf16>
    %c0_7 = arith.constant 0 : index
    %c0_8 = arith.constant 0 : index
    %12 = vector.load %arg7[%c0_7, %c0_8] : memref<16x96xf32, #tpu.memory_space<vmem>>, vector<16x96xf32>
    %cst_9 = arith.constant dense<0.000000e+00> : vector<16x96xf32>
    %13 = tpu.matmul %11, %9, %cst_9 {dimension_numbers = #tpu.dot_dimension_numbers<[1], [1], [0], [0], [0, 0, 1, 0], [], []>} : vector<16x32xbf16>, vector<96x32xbf16>, vector<16x96xf32> -> vector<16x96xf32>
    %14 = arith.addf %12, %13 : vector<16x96xf32>
    %c0_10 = arith.constant 0 : index
    %c0_11 = arith.constant 0 : index
    %15 = vector.load %arg7[%c0_10, %c0_11] : memref<16x96xf32, #tpu.memory_space<vmem>>, vector<16x96xf32>
    tpu.vector_store %arg7[%c0_10, %c0_11], %14 {strides = array<i32>} : memref<16x96xf32, #tpu.memory_space<vmem>>, vector<16x96xf32>,
    %c0_i32_12 = arith.constant 0 : i32
    %16 = arith.cmpi eq, %arg2, %c0_i32_12 : i32
    %17 = arith.extui %16 : i1 to i32
    %c0_i32_13 = arith.constant 0 : i32
    %18 = arith.cmpi ne, %17, %c0_i32_13 : i32
    scf.if %18 {
      %c0_14 = arith.constant 0 : index
      %c0_15 = arith.constant 0 : index
      %19 = vector.load %arg7[%c0_14, %c0_15] : memref<16x96xf32, #tpu.memory_space<vmem>>, vector<16x96xf32>
      %20 = arith.truncf %19 : vector<16x96xf32> to vector<16x96xbf16>
      %c0_16 = arith.constant 0 : index
      %c0_17 = arith.constant 0 : index
      %21 = vector.load %arg6[%c0_16, %c0_17] : memref<16x96xbf16, #tpu.memory_space<vmem>>, vector<16x96xbf16>
      tpu.vector_store %arg6[%c0_16, %c0_17], %20 {strides = array<i32>} : memref<16x96xbf16, #tpu.memory_space<vmem>>, vector<16x96xbf16>,
    } else {
    }
    return
  }
  func.func @transform_0(%arg0: i32, %arg1: i32, %arg2: i32) -> (i32, i32) {
    %c0_i32 = arith.constant 0 : i32
    return %arg0, %arg2 : i32, i32
  }
  func.func @transform_1(%arg0: i32, %arg1: i32, %arg2: i32) -> (i32, i32) {
    %c0_i32 = arith.constant 0 : i32
    return %arg1, %arg2 : i32, i32
  }
  func.func @transform_2(%arg0: i32, %arg1: i32, %arg2: i32) -> (i32, i32) {
    %c0_i32 = arith.constant 0 : i32
    return %arg1, %arg2 : i32, i32
  }
  func.func @transform_3(%arg0: i32, %arg1: i32, %arg2: i32) -> (i32, i32) {
    %c0_i32 = arith.constant 0 : i32
    return %arg0, %arg1 : i32, i32
  }
}

module attributes {stable_mosaic.version = 11 : i64} {
  func.func @_attention_kernel(%arg0: i32, %arg1: memref<1x8x96xbf16, #tpu.memory_space<vmem>>, %arg2: memref<1x8x32xbf16, #tpu.memory_space<vmem>>) attributes {dimension_semantics = [#tpu.dimension_semantics<parallel>], iteration_bounds = array<i64: 2>, scalar_prefetch = 0 : i64, scratch_operands = 0 : i64, tpu.core_type = #tpu.core_type<tc>, window_params = [{transform_indices = @transform_0, window_bounds = array<i64: 1, 8, 96>}, {transform_indices = @transform_1, window_bounds = array<i64: 1, 8, 32>}]} {
    %c0 = arith.constant 0 : index
    %c0_0 = arith.constant 0 : index
    %c0_1 = arith.constant 0 : index
    %0 = vector.load %arg1[%c0, %c0_0, %c0_1] : memref<1x8x96xbf16, #tpu.memory_space<vmem>>, vector<1x8x96xbf16>
    %1 = vector.shape_cast %0 : vector<1x8x96xbf16> to vector<8x96xbf16>
    %2 = vector.extract_strided_slice %1 {offsets = [0, 0], sizes = [8, 32], strides = [1, 1]} : vector<8x96xbf16> to vector<8x32xbf16>
    %3 = arith.extf %2 : vector<8x32xbf16> to vector<8x32xf32>
    %cst = arith.constant 0.176776692 : f32
    %4 = vector.broadcast %cst : f32 to vector<8x32xf32>
    %5 = arith.mulf %3, %4 : vector<8x32xf32>
    %6 = arith.truncf %5 : vector<8x32xf32> to vector<8x32xbf16>
    %7 = vector.extract_strided_slice %1 {offsets = [0, 32], sizes = [8, 32], strides = [1, 1]} : vector<8x96xbf16> to vector<8x32xbf16>
    %8 = vector.extract_strided_slice %1 {offsets = [0, 64], sizes = [8, 32], strides = [1, 1]} : vector<8x96xbf16> to vector<8x32xbf16>
    %9 = vector.extract_strided_slice %6 {offsets = [0, 0], sizes = [8, 4], strides = [1, 1]} : vector<8x32xbf16> to vector<8x4xbf16>
    %10 = vector.extract_strided_slice %7 {offsets = [0, 0], sizes = [8, 4], strides = [1, 1]} : vector<8x32xbf16> to vector<8x4xbf16>
    %11 = vector.extract_strided_slice %8 {offsets = [0, 0], sizes = [8, 4], strides = [1, 1]} : vector<8x32xbf16> to vector<8x4xbf16>
    %cst_2 = arith.constant dense<0.000000e+00> : vector<8x8xf32>
    %12 = tpu.matmul %9, %10, %cst_2 {dimension_numbers = #tpu.dot_dimension_numbers<[1], [1], [0], [0], [0, 0, 1, 0], [], []>} : vector<8x4xbf16>, vector<8x4xbf16>, vector<8x8xf32> -> vector<8x8xf32>
    %cst_3 = arith.constant dense<0xFF800000> : vector<8xf32>
    %13 = vector.multi_reduction <maximumf>, %12, %cst_3 [1] : vector<8x8xf32> to vector<8xf32>
    %14 = vector.shape_cast %13 : vector<8xf32> to vector<8x1xf32>
    %15 = vector.broadcast %14 : vector<8x1xf32> to vector<8x8xf32>
    %16 = arith.subf %12, %15 : vector<8x8xf32>
    %17 = math.exp %16 : vector<8x8xf32>
    %cst_4 = arith.constant dense<0.000000e+00> : vector<8xf32>
    %18 = vector.multi_reduction <add>, %17, %cst_4 [1] : vector<8x8xf32> to vector<8xf32>
    %19 = vector.shape_cast %18 : vector<8xf32> to vector<8x1xf32>
    %20 = tpu.reciprocal %19 {approx = true} : vector<8x1xf32> -> vector<8x1xf32>
    %21 = vector.broadcast %20 : vector<8x1xf32> to vector<8x8xf32>
    %22 = arith.mulf %17, %21 : vector<8x8xf32>
    %23 = arith.truncf %22 : vector<8x8xf32> to vector<8x8xbf16>
    %cst_5 = arith.constant dense<0.000000e+00> : vector<8x4xf32>
    %24 = tpu.matmul %23, %11, %cst_5 {dimension_numbers = #tpu.dot_dimension_numbers<[1], [0], [0], [1], [0, 0, 1, 1], [], []>} : vector<8x8xbf16>, vector<8x4xbf16>, vector<8x4xf32> -> vector<8x4xf32>
    %25 = vector.extract_strided_slice %6 {offsets = [0, 4], sizes = [8, 4], strides = [1, 1]} : vector<8x32xbf16> to vector<8x4xbf16>
    %26 = vector.extract_strided_slice %7 {offsets = [0, 4], sizes = [8, 4], strides = [1, 1]} : vector<8x32xbf16> to vector<8x4xbf16>
    %27 = vector.extract_strided_slice %8 {offsets = [0, 4], sizes = [8, 4], strides = [1, 1]} : vector<8x32xbf16> to vector<8x4xbf16>
    %cst_6 = arith.constant dense<0.000000e+00> : vector<8x8xf32>
    %28 = tpu.matmul %25, %26, %cst_6 {dimension_numbers = #tpu.dot_dimension_numbers<[1], [1], [0], [0], [0, 0, 1, 0], [], []>} : vector<8x4xbf16>, vector<8x4xbf16>, vector<8x8xf32> -> vector<8x8xf32>
    %cst_7 = arith.constant dense<0xFF800000> : vector<8xf32>
    %29 = vector.multi_reduction <maximumf>, %28, %cst_7 [1] : vector<8x8xf32> to vector<8xf32>
    %30 = vector.shape_cast %29 : vector<8xf32> to vector<8x1xf32>
    %31 = vector.broadcast %30 : vector<8x1xf32> to vector<8x8xf32>
    %32 = arith.subf %28, %31 : vector<8x8xf32>
    %33 = math.exp %32 : vector<8x8xf32>
    %cst_8 = arith.constant dense<0.000000e+00> : vector<8xf32>
    %34 = vector.multi_reduction <add>, %33, %cst_8 [1] : vector<8x8xf32> to vector<8xf32>
    %35 = vector.shape_cast %34 : vector<8xf32> to vector<8x1xf32>
    %36 = tpu.reciprocal %35 {approx = true} : vector<8x1xf32> -> vector<8x1xf32>
    %37 = vector.broadcast %36 : vector<8x1xf32> to vector<8x8xf32>
    %38 = arith.mulf %33, %37 : vector<8x8xf32>
    %39 = arith.truncf %38 : vector<8x8xf32> to vector<8x8xbf16>
    %cst_9 = arith.constant dense<0.000000e+00> : vector<8x4xf32>
    %40 = tpu.matmul %39, %27, %cst_9 {dimension_numbers = #tpu.dot_dimension_numbers<[1], [0], [0], [1], [0, 0, 1, 1], [], []>} : vector<8x8xbf16>, vector<8x4xbf16>, vector<8x4xf32> -> vector<8x4xf32>
    %41 = vector.extract_strided_slice %6 {offsets = [0, 8], sizes = [8, 4], strides = [1, 1]} : vector<8x32xbf16> to vector<8x4xbf16>
    %42 = vector.extract_strided_slice %7 {offsets = [0, 8], sizes = [8, 4], strides = [1, 1]} : vector<8x32xbf16> to vector<8x4xbf16>
    %43 = vector.extract_strided_slice %8 {offsets = [0, 8], sizes = [8, 4], strides = [1, 1]} : vector<8x32xbf16> to vector<8x4xbf16>
    %cst_10 = arith.constant dense<0.000000e+00> : vector<8x8xf32>
    %44 = tpu.matmul %41, %42, %cst_10 {dimension_numbers = #tpu.dot_dimension_numbers<[1], [1], [0], [0], [0, 0, 1, 0], [], []>} : vector<8x4xbf16>, vector<8x4xbf16>, vector<8x8xf32> -> vector<8x8xf32>
    %cst_11 = arith.constant dense<0xFF800000> : vector<8xf32>
    %45 = vector.multi_reduction <maximumf>, %44, %cst_11 [1] : vector<8x8xf32> to vector<8xf32>
    %46 = vector.shape_cast %45 : vector<8xf32> to vector<8x1xf32>
    %47 = vector.broadcast %46 : vector<8x1xf32> to vector<8x8xf32>
    %48 = arith.subf %44, %47 : vector<8x8xf32>
    %49 = math.exp %48 : vector<8x8xf32>
    %cst_12 = arith.constant dense<0.000000e+00> : vector<8xf32>
    %50 = vector.multi_reduction <add>, %49, %cst_12 [1] : vector<8x8xf32> to vector<8xf32>
    %51 = vector.shape_cast %50 : vector<8xf32> to vector<8x1xf32>
    %52 = tpu.reciprocal %51 {approx = true} : vector<8x1xf32> -> vector<8x1xf32>
    %53 = vector.broadcast %52 : vector<8x1xf32> to vector<8x8xf32>
    %54 = arith.mulf %49, %53 : vector<8x8xf32>
    %55 = arith.truncf %54 : vector<8x8xf32> to vector<8x8xbf16>
    %cst_13 = arith.constant dense<0.000000e+00> : vector<8x4xf32>
    %56 = tpu.matmul %55, %43, %cst_13 {dimension_numbers = #tpu.dot_dimension_numbers<[1], [0], [0], [1], [0, 0, 1, 1], [], []>} : vector<8x8xbf16>, vector<8x4xbf16>, vector<8x4xf32> -> vector<8x4xf32>
    %57 = vector.extract_strided_slice %6 {offsets = [0, 12], sizes = [8, 4], strides = [1, 1]} : vector<8x32xbf16> to vector<8x4xbf16>
    %58 = vector.extract_strided_slice %7 {offsets = [0, 12], sizes = [8, 4], strides = [1, 1]} : vector<8x32xbf16> to vector<8x4xbf16>
    %59 = vector.extract_strided_slice %8 {offsets = [0, 12], sizes = [8, 4], strides = [1, 1]} : vector<8x32xbf16> to vector<8x4xbf16>
    %cst_14 = arith.constant dense<0.000000e+00> : vector<8x8xf32>
    %60 = tpu.matmul %57, %58, %cst_14 {dimension_numbers = #tpu.dot_dimension_numbers<[1], [1], [0], [0], [0, 0, 1, 0], [], []>} : vector<8x4xbf16>, vector<8x4xbf16>, vector<8x8xf32> -> vector<8x8xf32>
    %cst_15 = arith.constant dense<0xFF800000> : vector<8xf32>
    %61 = vector.multi_reduction <maximumf>, %60, %cst_15 [1] : vector<8x8xf32> to vector<8xf32>
    %62 = vector.shape_cast %61 : vector<8xf32> to vector<8x1xf32>
    %63 = vector.broadcast %62 : vector<8x1xf32> to vector<8x8xf32>
    %64 = arith.subf %60, %63 : vector<8x8xf32>
    %65 = math.exp %64 : vector<8x8xf32>
    %cst_16 = arith.constant dense<0.000000e+00> : vector<8xf32>
    %66 = vector.multi_reduction <add>, %65, %cst_16 [1] : vector<8x8xf32> to vector<8xf32>
    %67 = vector.shape_cast %66 : vector<8xf32> to vector<8x1xf32>
    %68 = tpu.reciprocal %67 {approx = true} : vector<8x1xf32> -> vector<8x1xf32>
    %69 = vector.broadcast %68 : vector<8x1xf32> to vector<8x8xf32>
    %70 = arith.mulf %65, %69 : vector<8x8xf32>
    %71 = arith.truncf %70 : vector<8x8xf32> to vector<8x8xbf16>
    %cst_17 = arith.constant dense<0.000000e+00> : vector<8x4xf32>
    %72 = tpu.matmul %71, %59, %cst_17 {dimension_numbers = #tpu.dot_dimension_numbers<[1], [0], [0], [1], [0, 0, 1, 1], [], []>} : vector<8x8xbf16>, vector<8x4xbf16>, vector<8x4xf32> -> vector<8x4xf32>
    %73 = vector.extract_strided_slice %6 {offsets = [0, 16], sizes = [8, 4], strides = [1, 1]} : vector<8x32xbf16> to vector<8x4xbf16>
    %74 = vector.extract_strided_slice %7 {offsets = [0, 16], sizes = [8, 4], strides = [1, 1]} : vector<8x32xbf16> to vector<8x4xbf16>
    %75 = vector.extract_strided_slice %8 {offsets = [0, 16], sizes = [8, 4], strides = [1, 1]} : vector<8x32xbf16> to vector<8x4xbf16>
    %cst_18 = arith.constant dense<0.000000e+00> : vector<8x8xf32>
    %76 = tpu.matmul %73, %74, %cst_18 {dimension_numbers = #tpu.dot_dimension_numbers<[1], [1], [0], [0], [0, 0, 1, 0], [], []>} : vector<8x4xbf16>, vector<8x4xbf16>, vector<8x8xf32> -> vector<8x8xf32>
    %cst_19 = arith.constant dense<0xFF800000> : vector<8xf32>
    %77 = vector.multi_reduction <maximumf>, %76, %cst_19 [1] : vector<8x8xf32> to vector<8xf32>
    %78 = vector.shape_cast %77 : vector<8xf32> to vector<8x1xf32>
    %79 = vector.broadcast %78 : vector<8x1xf32> to vector<8x8xf32>
    %80 = arith.subf %76, %79 : vector<8x8xf32>
    %81 = math.exp %80 : vector<8x8xf32>
    %cst_20 = arith.constant dense<0.000000e+00> : vector<8xf32>
    %82 = vector.multi_reduction <add>, %81, %cst_20 [1] : vector<8x8xf32> to vector<8xf32>
    %83 = vector.shape_cast %82 : vector<8xf32> to vector<8x1xf32>
    %84 = tpu.reciprocal %83 {approx = true} : vector<8x1xf32> -> vector<8x1xf32>
    %85 = vector.broadcast %84 : vector<8x1xf32> to vector<8x8xf32>
    %86 = arith.mulf %81, %85 : vector<8x8xf32>
    %87 = arith.truncf %86 : vector<8x8xf32> to vector<8x8xbf16>
    %cst_21 = arith.constant dense<0.000000e+00> : vector<8x4xf32>
    %88 = tpu.matmul %87, %75, %cst_21 {dimension_numbers = #tpu.dot_dimension_numbers<[1], [0], [0], [1], [0, 0, 1, 1], [], []>} : vector<8x8xbf16>, vector<8x4xbf16>, vector<8x4xf32> -> vector<8x4xf32>
    %89 = vector.extract_strided_slice %6 {offsets = [0, 20], sizes = [8, 4], strides = [1, 1]} : vector<8x32xbf16> to vector<8x4xbf16>
    %90 = vector.extract_strided_slice %7 {offsets = [0, 20], sizes = [8, 4], strides = [1, 1]} : vector<8x32xbf16> to vector<8x4xbf16>
    %91 = vector.extract_strided_slice %8 {offsets = [0, 20], sizes = [8, 4], strides = [1, 1]} : vector<8x32xbf16> to vector<8x4xbf16>
    %cst_22 = arith.constant dense<0.000000e+00> : vector<8x8xf32>
    %92 = tpu.matmul %89, %90, %cst_22 {dimension_numbers = #tpu.dot_dimension_numbers<[1], [1], [0], [0], [0, 0, 1, 0], [], []>} : vector<8x4xbf16>, vector<8x4xbf16>, vector<8x8xf32> -> vector<8x8xf32>
    %cst_23 = arith.constant dense<0xFF800000> : vector<8xf32>
    %93 = vector.multi_reduction <maximumf>, %92, %cst_23 [1] : vector<8x8xf32> to vector<8xf32>
    %94 = vector.shape_cast %93 : vector<8xf32> to vector<8x1xf32>
    %95 = vector.broadcast %94 : vector<8x1xf32> to vector<8x8xf32>
    %96 = arith.subf %92, %95 : vector<8x8xf32>
    %97 = math.exp %96 : vector<8x8xf32>
    %cst_24 = arith.constant dense<0.000000e+00> : vector<8xf32>
    %98 = vector.multi_reduction <add>, %97, %cst_24 [1] : vector<8x8xf32> to vector<8xf32>
    %99 = vector.shape_cast %98 : vector<8xf32> to vector<8x1xf32>
    %100 = tpu.reciprocal %99 {approx = true} : vector<8x1xf32> -> vector<8x1xf32>
    %101 = vector.broadcast %100 : vector<8x1xf32> to vector<8x8xf32>
    %102 = arith.mulf %97, %101 : vector<8x8xf32>
    %103 = arith.truncf %102 : vector<8x8xf32> to vector<8x8xbf16>
    %cst_25 = arith.constant dense<0.000000e+00> : vector<8x4xf32>
    %104 = tpu.matmul %103, %91, %cst_25 {dimension_numbers = #tpu.dot_dimension_numbers<[1], [0], [0], [1], [0, 0, 1, 1], [], []>} : vector<8x8xbf16>, vector<8x4xbf16>, vector<8x4xf32> -> vector<8x4xf32>
    %105 = vector.extract_strided_slice %6 {offsets = [0, 24], sizes = [8, 4], strides = [1, 1]} : vector<8x32xbf16> to vector<8x4xbf16>
    %106 = vector.extract_strided_slice %7 {offsets = [0, 24], sizes = [8, 4], strides = [1, 1]} : vector<8x32xbf16> to vector<8x4xbf16>
    %107 = vector.extract_strided_slice %8 {offsets = [0, 24], sizes = [8, 4], strides = [1, 1]} : vector<8x32xbf16> to vector<8x4xbf16>
    %cst_26 = arith.constant dense<0.000000e+00> : vector<8x8xf32>
    %108 = tpu.matmul %105, %106, %cst_26 {dimension_numbers = #tpu.dot_dimension_numbers<[1], [1], [0], [0], [0, 0, 1, 0], [], []>} : vector<8x4xbf16>, vector<8x4xbf16>, vector<8x8xf32> -> vector<8x8xf32>
    %cst_27 = arith.constant dense<0xFF800000> : vector<8xf32>
    %109 = vector.multi_reduction <maximumf>, %108, %cst_27 [1] : vector<8x8xf32> to vector<8xf32>
    %110 = vector.shape_cast %109 : vector<8xf32> to vector<8x1xf32>
    %111 = vector.broadcast %110 : vector<8x1xf32> to vector<8x8xf32>
    %112 = arith.subf %108, %111 : vector<8x8xf32>
    %113 = math.exp %112 : vector<8x8xf32>
    %cst_28 = arith.constant dense<0.000000e+00> : vector<8xf32>
    %114 = vector.multi_reduction <add>, %113, %cst_28 [1] : vector<8x8xf32> to vector<8xf32>
    %115 = vector.shape_cast %114 : vector<8xf32> to vector<8x1xf32>
    %116 = tpu.reciprocal %115 {approx = true} : vector<8x1xf32> -> vector<8x1xf32>
    %117 = vector.broadcast %116 : vector<8x1xf32> to vector<8x8xf32>
    %118 = arith.mulf %113, %117 : vector<8x8xf32>
    %119 = arith.truncf %118 : vector<8x8xf32> to vector<8x8xbf16>
    %cst_29 = arith.constant dense<0.000000e+00> : vector<8x4xf32>
    %120 = tpu.matmul %119, %107, %cst_29 {dimension_numbers = #tpu.dot_dimension_numbers<[1], [0], [0], [1], [0, 0, 1, 1], [], []>} : vector<8x8xbf16>, vector<8x4xbf16>, vector<8x4xf32> -> vector<8x4xf32>
    %121 = vector.extract_strided_slice %6 {offsets = [0, 28], sizes = [8, 4], strides = [1, 1]} : vector<8x32xbf16> to vector<8x4xbf16>
    %122 = vector.extract_strided_slice %7 {offsets = [0, 28], sizes = [8, 4], strides = [1, 1]} : vector<8x32xbf16> to vector<8x4xbf16>
    %123 = vector.extract_strided_slice %8 {offsets = [0, 28], sizes = [8, 4], strides = [1, 1]} : vector<8x32xbf16> to vector<8x4xbf16>
    %cst_30 = arith.constant dense<0.000000e+00> : vector<8x8xf32>
    %124 = tpu.matmul %121, %122, %cst_30 {dimension_numbers = #tpu.dot_dimension_numbers<[1], [1], [0], [0], [0, 0, 1, 0], [], []>} : vector<8x4xbf16>, vector<8x4xbf16>, vector<8x8xf32> -> vector<8x8xf32>
    %cst_31 = arith.constant dense<0xFF800000> : vector<8xf32>
    %125 = vector.multi_reduction <maximumf>, %124, %cst_31 [1] : vector<8x8xf32> to vector<8xf32>
    %126 = vector.shape_cast %125 : vector<8xf32> to vector<8x1xf32>
    %127 = vector.broadcast %126 : vector<8x1xf32> to vector<8x8xf32>
    %128 = arith.subf %124, %127 : vector<8x8xf32>
    %129 = math.exp %128 : vector<8x8xf32>
    %cst_32 = arith.constant dense<0.000000e+00> : vector<8xf32>
    %130 = vector.multi_reduction <add>, %129, %cst_32 [1] : vector<8x8xf32> to vector<8xf32>
    %131 = vector.shape_cast %130 : vector<8xf32> to vector<8x1xf32>
    %132 = tpu.reciprocal %131 {approx = true} : vector<8x1xf32> -> vector<8x1xf32>
    %133 = vector.broadcast %132 : vector<8x1xf32> to vector<8x8xf32>
    %134 = arith.mulf %129, %133 : vector<8x8xf32>
    %135 = arith.truncf %134 : vector<8x8xf32> to vector<8x8xbf16>
    %cst_33 = arith.constant dense<0.000000e+00> : vector<8x4xf32>
    %136 = tpu.matmul %135, %123, %cst_33 {dimension_numbers = #tpu.dot_dimension_numbers<[1], [0], [0], [1], [0, 0, 1, 1], [], []>} : vector<8x8xbf16>, vector<8x4xbf16>, vector<8x4xf32> -> vector<8x4xf32>
    %137 = tpu.concatenate %24, %40, %56, %72, %88, %104, %120, %136 in 1 : vector<8x4xf32>, vector<8x4xf32>, vector<8x4xf32>, vector<8x4xf32>, vector<8x4xf32>, vector<8x4xf32>, vector<8x4xf32>, vector<8x4xf32> -> vector<8x32xf32>
    %138 = arith.truncf %137 : vector<8x32xf32> to vector<8x32xbf16>
    %c0_34 = arith.constant 0 : index
    %c0_35 = arith.constant 0 : index
    %c0_36 = arith.constant 0 : index
    %139 = vector.load %arg2[%c0_34, %c0_35, %c0_36] : memref<1x8x32xbf16, #tpu.memory_space<vmem>>, vector<1x8x32xbf16>
    %140 = vector.shape_cast %139 : vector<1x8x32xbf16> to vector<8x32xbf16>
    %141 = vector.shape_cast %138 : vector<8x32xbf16> to vector<1x8x32xbf16>
    tpu.vector_store %arg2[%c0_34, %c0_35, %c0_36], %141 {strides = array<i32>} : memref<1x8x32xbf16, #tpu.memory_space<vmem>>, vector<1x8x32xbf16>,
    return
  }
  func.func @transform_0(%arg0: i32) -> (i32, i32, i32) {
    %c0_i32 = arith.constant 0 : i32
    %c0_i32_0 = arith.constant 0 : i32
    %c0_i32_1 = arith.constant 0 : i32
    return %arg0, %c0_i32, %c0_i32_0 : i32, i32, i32
  }
  func.func @transform_1(%arg0: i32) -> (i32, i32, i32) {
    %c0_i32 = arith.constant 0 : i32
    %c0_i32_0 = arith.constant 0 : i32
    %c0_i32_1 = arith.constant 0 : i32
    return %arg0, %c0_i32, %c0_i32_0 : i32, i32, i32
  }
}

module attributes {stable_mosaic.version = 11 : i64} {
  func.func @_masked_linear_bias_kernel(%arg0: i32, %arg1: i32, %arg2: i32, %arg3: memref<16x32xbf16, #tpu.memory_space<vmem>>, %arg4: memref<32x32xf32, #tpu.memory_space<vmem>>, %arg5: memref<32x32xf32, #tpu.memory_space<vmem>>, %arg6: memref<1x32xf32, #tpu.memory_space<vmem>>, %arg7: memref<1x32xf32, #tpu.memory_space<vmem>>, %arg8: memref<16x32xf32, #tpu.memory_space<vmem>>, %arg9: memref<16x32xf32, #tpu.memory_space<vmem>>) attributes {dimension_semantics = [#tpu.dimension_semantics<parallel>, #tpu.dimension_semantics<parallel>, #tpu.dimension_semantics<arbitrary>], iteration_bounds = array<i64: 1, 1, 1>, scalar_prefetch = 0 : i64, scratch_operands = 1 : i64, tpu.core_type = #tpu.core_type<tc>, window_params = [{transform_indices = @transform_0, window_bounds = array<i64: 16, 32>}, {transform_indices = @transform_1, window_bounds = array<i64: 32, 32>}, {transform_indices = @transform_2, window_bounds = array<i64: 32, 32>}, {transform_indices = @transform_3, window_bounds = array<i64: 1, 32>}, {transform_indices = @transform_4, window_bounds = array<i64: 1, 32>}, {transform_indices = @transform_5, window_bounds = array<i64: 16, 32>}]} {
    %c0_i32 = arith.constant 0 : i32
    %0 = arith.cmpi eq, %arg2, %c0_i32 : i32
    %1 = arith.extui %0 : i1 to i32
    %c0_i32_0 = arith.constant 0 : i32
    %2 = arith.cmpi ne, %1, %c0_i32_0 : i32
    scf.if %2 {
      %cst_14 = arith.constant 0.000000e+00 : f32
      %18 = vector.broadcast %cst_14 : f32 to vector<16x32xf32>
      %c0_15 = arith.constant 0 : index
      %c0_16 = arith.constant 0 : index
      %19 = vector.load %arg9[%c0_15, %c0_16] : memref<16x32xf32, #tpu.memory_space<vmem>>, vector<16x32xf32>
      tpu.vector_store %arg9[%c0_15, %c0_16], %18 {strides = array<i32>} : memref<16x32xf32, #tpu.memory_space<vmem>>, vector<16x32xf32>,
    } else {
    }
    %c0 = arith.constant 0 : index
    %c0_1 = arith.constant 0 : index
    %3 = vector.load %arg5[%c0, %c0_1] : memref<32x32xf32, #tpu.memory_space<vmem>>, vector<32x32xf32>
    %cst = arith.constant 0.000000e+00 : f32
    %4 = vector.broadcast %cst : f32 to vector<32x32xf32>
    %5 = arith.cmpf ogt, %3, %4 : vector<32x32xf32>
    %c0_2 = arith.constant 0 : index
    %c0_3 = arith.constant 0 : index
    %6 = vector.load %arg4[%c0_2, %c0_3] : memref<32x32xf32, #tpu.memory_space<vmem>>, vector<32x32xf32>
    %cst_4 = arith.constant 0.000000e+00 : f32
    %7 = vector.broadcast %cst_4 : f32 to vector<32x32xf32>
    %8 = arith.select %5, %6, %7 : vector<32x32xi1>, vector<32x32xf32>
    %9 = arith.truncf %8 : vector<32x32xf32> to vector<32x32xbf16>
    %c0_5 = arith.constant 0 : index
    %c0_6 = arith.constant 0 : index
    %10 = vector.load %arg3[%c0_5, %c0_6] : memref<16x32xbf16, #tpu.memory_space<vmem>>, vector<16x32xbf16>
    %c0_7 = arith.constant 0 : index
    %c0_8 = arith.constant 0 : index
    %11 = vector.load %arg9[%c0_7, %c0_8] : memref<16x32xf32, #tpu.memory_space<vmem>>, vector<16x32xf32>
    %cst_9 = arith.constant dense<0.000000e+00> : vector<16x32xf32>
    %12 = tpu.matmul %10, %9, %cst_9 {dimension_numbers = #tpu.dot_dimension_numbers<[1], [1], [0], [0], [0, 0, 1, 0], [], []>} : vector<16x32xbf16>, vector<32x32xbf16>, vector<16x32xf32> -> vector<16x32xf32>
    %13 = arith.addf %11, %12 : vector<16x32xf32>
    %c0_10 = arith.constant 0 : index
    %c0_11 = arith.constant 0 : index
    %14 = vector.load %arg9[%c0_10, %c0_11] : memref<16x32xf32, #tpu.memory_space<vmem>>, vector<16x32xf32>
    tpu.vector_store %arg9[%c0_10, %c0_11], %13 {strides = array<i32>} : memref<16x32xf32, #tpu.memory_space<vmem>>, vector<16x32xf32>,
    %c0_i32_12 = arith.constant 0 : i32
    %15 = arith.cmpi eq, %arg2, %c0_i32_12 : i32
    %16 = arith.extui %15 : i1 to i32
    %c0_i32_13 = arith.constant 0 : i32
    %17 = arith.cmpi ne, %16, %c0_i32_13 : i32
    scf.if %17 {
      %c0_14 = arith.constant 0 : index
      %c0_15 = arith.constant 0 : index
      %18 = vector.load %arg7[%c0_14, %c0_15] : memref<1x32xf32, #tpu.memory_space<vmem>>, vector<1x32xf32>
      %cst_16 = arith.constant 0.000000e+00 : f32
      %19 = vector.broadcast %cst_16 : f32 to vector<1x32xf32>
      %20 = arith.cmpf ogt, %18, %19 : vector<1x32xf32>
      %c0_17 = arith.constant 0 : index
      %c0_18 = arith.constant 0 : index
      %21 = vector.load %arg6[%c0_17, %c0_18] : memref<1x32xf32, #tpu.memory_space<vmem>>, vector<1x32xf32>
      %cst_19 = arith.constant 0.000000e+00 : f32
      %22 = vector.broadcast %cst_19 : f32 to vector<1x32xf32>
      %23 = arith.select %20, %21, %22 : vector<1x32xi1>, vector<1x32xf32>
      %c0_20 = arith.constant 0 : index
      %c0_21 = arith.constant 0 : index
      %24 = vector.load %arg9[%c0_20, %c0_21] : memref<16x32xf32, #tpu.memory_space<vmem>>, vector<16x32xf32>
      %25 = vector.broadcast %23 : vector<1x32xf32> to vector<16x32xf32>
      %26 = arith.addf %24, %25 : vector<16x32xf32>
      %c0_22 = arith.constant 0 : index
      %c0_23 = arith.constant 0 : index
      %27 = vector.load %arg8[%c0_22, %c0_23] : memref<16x32xf32, #tpu.memory_space<vmem>>, vector<16x32xf32>
      tpu.vector_store %arg8[%c0_22, %c0_23], %26 {strides = array<i32>} : memref<16x32xf32, #tpu.memory_space<vmem>>, vector<16x32xf32>,
    } else {
    }
    return
  }
  func.func @transform_0(%arg0: i32, %arg1: i32, %arg2: i32) -> (i32, i32) {
    %c0_i32 = arith.constant 0 : i32
    return %arg0, %arg2 : i32, i32
  }
  func.func @transform_1(%arg0: i32, %arg1: i32, %arg2: i32) -> (i32, i32) {
    %c0_i32 = arith.constant 0 : i32
    return %arg1, %arg2 : i32, i32
  }
  func.func @transform_2(%arg0: i32, %arg1: i32, %arg2: i32) -> (i32, i32) {
    %c0_i32 = arith.constant 0 : i32
    return %arg1, %arg2 : i32, i32
  }
  func.func @transform_3(%arg0: i32, %arg1: i32, %arg2: i32) -> (i32, i32) {
    %c0_i32 = arith.constant 0 : i32
    %c0_i32_0 = arith.constant 0 : i32
    return %c0_i32, %arg1 : i32, i32
  }
  func.func @transform_4(%arg0: i32, %arg1: i32, %arg2: i32) -> (i32, i32) {
    %c0_i32 = arith.constant 0 : i32
    %c0_i32_0 = arith.constant 0 : i32
    return %c0_i32, %arg1 : i32, i32
  }
  func.func @transform_5(%arg0: i32, %arg1: i32, %arg2: i32) -> (i32, i32) {
    %c0_i32 = arith.constant 0 : i32
    return %arg0, %arg1 : i32, i32
  }
}

</mosaic_0001>

<bundles_post_ra>
// kernel: attention_forward.3
= control target key start
LH: loop header
LB: loop body
LE: loop exit
PB: predicated region body
PF: predicated region fallthrough
CT: control target
= control target key end

     0   :  { %vm81_vm2 = vcmask 261120   ;;  %vm19_vm9 = vcmask 785408   ;;  %v138_v32 = vmov 0.0   ;;  %vm129_vm14 = vcmask 781312   ;;  %s254_s1 = inlined_call_operand.vmem [shape: f32[96,32], index: 1, kind: input, shape index: {}]   ;;  %s255_s2 = inlined_call_operand.vmem [shape: f32[96,32], index: 2, kind: input, shape index: {}]   ;;  %s256_s0 = inlined_call_operand.vmem [shape: f32[16,32], index: 0, kind: input, shape index: {}]   ;;  %s257_s3 = inlined_call_operand.vmem [shape: bf16[16,96], index: 3, kind: output, shape index: {}]  }
   0x1   :  { %v32_v0 = vld [vmem:[%s255_s2 + $0x50] sm:$0xff]  ;;  %v33_v1 = vld [vmem:[%s255_s2 + $0x58] sm:$0xff]  ;;  %v30_v4 = vld [vmem:[%s255_s2 + $0x40] sm:$0xff]  ;;  %20 = vst.msk [vmem:[#allocation2] sm:$0xff] %vm19_vm9, %v138_v32 }
   0x2   :  { %v56_v2 = vld [vmem:[%s254_s1 + $0x50] sm:$0xff]  ;;  %vm44_vm0 = vcmp.gt.f32.partialorder %v32_v0, 0.0  ;;  %vm45_vm1 = vcmp.gt.f32.partialorder %v33_v1, 0.0  ;;  %v57_v3 = vld [vmem:[%s254_s1 + $0x58] sm:$0xff]  ;;  %v31_v5 = vld [vmem:[%s255_s2 + $0x48] sm:$0xff]  ;;  %vm42_vm3 = vcmp.gt.f32.partialorder %v30_v4, 0.0 }
   0x3   :  { %v68_v6 = vsel %vm44_vm0, %v56_v2, 0.0  ;;  %v69_v7 = vsel %vm45_vm1, %v57_v3, 0.0  ;;  %vm43_vm4 = vcmp.gt.f32.partialorder %v31_v5, 0.0  ;;  %v54_v8 = vld [vmem:[%s254_s1 + $0x40] sm:$0xff]  ;;  %v55_v9 = vld [vmem:[%s254_s1 + $0x48] sm:$0xff]  ;;  %v28_v14 = vld [vmem:[%s255_s2 + $0x30] sm:$0xff] }
   0x4   :  { %v75_v10 = vpack.c.bf16 %v69_v7, %v68_v6  ;;  %v66_v11 = vsel %vm42_vm3, %v54_v8, 0.0  ;;  %v67_v12 = vsel %vm43_vm4, %v55_v9, 0.0  ;;  %v29_v15 = vld [vmem:[%s255_s2 + $0x38] sm:$0xff]  ;;  %vm40_vm5 = vcmp.gt.f32.partialorder %v28_v14, 0.0  ;;  %v52_v17 = vld [vmem:[%s254_s1 + $0x30] sm:$0xff]  ;;  %v26_v22 = vld [vmem:[%s255_s2 + $0x20] sm:$0xff] }
   0x5   :  { %v74_v16 = vpack.c.bf16 %v67_v12, %v66_v11  ;;  %vm41_vm6 = vcmp.gt.f32.partialorder %v29_v15, 0.0  ;;  %v53_v18 = vld [vmem:[%s254_s1 + $0x38] sm:$0xff]  ;;  %v64_v20 = vsel %vm40_vm5, %v52_v17, 0.0  ;;  %v27_v23 = vld [vmem:[%s255_s2 + $0x28] sm:$0xff]  ;;  %vm38_vm7 = vcmp.gt.f32.partialorder %v26_v22, 0.0  ;;  %v50_v25 = vld [vmem:[%s254_s1 + $0x20] sm:$0xff] }
   0x6   :  { %v101_v13 = vsel %vm81_vm2, %v75_v10, 0  ;;  %v65_v21 = vsel %vm41_vm6, %v53_v18, 0.0  ;;  %vm39_vm8 = vcmp.gt.f32.partialorder %v27_v23, 0.0  ;;  %v51_v26 = vld [vmem:[%s254_s1 + $0x28] sm:$0xff]  ;;  %v62_v28 = vsel %vm38_vm7, %v50_v25, 0.0  ;;  %v24_v30 = vld [vmem:[%s255_s2 + $0x10] sm:$0xff] }
   0x7   :  { %105 = vmatpush.bf16.xpose.msra.mxu0 %v101_v13  ;;  %v98_v19 = vsel %vm81_vm2, %v74_v16, 0  ;;  %v73_v24 = vpack.c.bf16 %v65_v21, %v64_v20  ;;  %v63_v29 = vsel %vm39_vm8, %v51_v26, 0.0  ;;  %v25_v31 = vld [vmem:[%s255_s2 + $0x18] sm:$0xff]  ;;  %21 = vst.msk [vmem:[#allocation2 + $0x8] sm:$0xff] %vm19_vm9, %v138_v32  ;;  %vm36_vm10 = vcmp.gt.f32.partialorder %v24_v30, 0.0  ;;  %v48_v34 = vld [vmem:[%s254_s1 + $0x10] sm:$0xff] }
   0x8   :  { %v72_v33 = vpack.c.bf16 %v63_v29, %v62_v28  ;;  %vm37_vm11 = vcmp.gt.f32.partialorder %v25_v31, 0.0  ;;  %v49_v35 = vld [vmem:[%s254_s1 + $0x18] sm:$0xff]  ;;  %v60_v37 = vsel %vm36_vm10, %v48_v34, 0.0  ;;  %v22_v39 = vld [vmem:[%s255_s2] sm:$0xff]  ;;  %v23_v40 = vld [vmem:[%s255_s2 + $0x8] sm:$0xff] }
   0x9   :  { %v95_v27 = vsel %vm81_vm2, %v73_v24, 0  ;;  %v61_v38 = vsel %vm37_vm11, %v49_v35, 0.0  ;;  %vm34_vm12 = vcmp.gt.f32.partialorder %v22_v39, 0.0  ;;  %vm35_vm13 = vcmp.gt.f32.partialorder %v23_v40, 0.0  ;;  %v46_v42 = vld [vmem:[%s254_s1] sm:$0xff]  ;;  %v47_v43 = vld [vmem:[%s254_s1 + $0x8] sm:$0xff] }
   0xa   :  { %v92_v36 = vsel %vm81_vm2, %v72_v33, 0  ;;  %v71_v41 = vpack.c.bf16 %v61_v38, %v60_v37  ;;  %v58_v45 = vsel %vm34_vm12, %v46_v42, 0.0  ;;  %v59_v46 = vsel %vm35_vm13, %v47_v43, 0.0  ;;  %v76_v49 = vld [vmem:[%s256_s0] sm:$0xff]  ;;  %v77_v50 = vld [vmem:[%s256_s0 + $0x8] sm:$0xff] }
   0xb   :  { %v70_v47 = vpack.c.bf16 %v59_v46, %v58_v45  ;;  %v78_v51 = vpack.c.bf16 %v77_v50, %v76_v49  ;;  %v79_v52 = vld [vmem:[#allocation2] sm:$0xff] }
   0xc   :  { %v89_v44 = vsel %vm81_vm2, %v71_v41, 0 }
   0xd   :  { %v86_v48 = vsel %vm81_vm2, %v70_v47, 0 }
   0xe   :  { %v80_v55 = vld [vmem:[#allocation2 + $0x8] sm:$0xff] }
   0xf   :  { %106 = vmatpush.bf16.xpose.msra.mxu0 %v98_v19 }
  0x17   :  { %107 = vmatpush.bf16.xpose.msra.mxu0 %v95_v27 }
  0x1f   :  { %108 = vmatpush.bf16.xpose.msra.mxu0 %v92_v36 }
  0x27   :  { %109 = vmatpush.bf16.xpose.msra.mxu0 %v89_v44 }
  0x2f   :  { %110 = vmatpush.bf16.xpose.msra.mxu0 %v86_v48 }
  0x36   :  { %136 = vmatmul.msk.bf16.vlgmr.msra.gmra.mxu0 %vm81_vm2, %v78_v51 }
  0xb3   :  { %v112_v53 = vpop.f32.mrf.mxu0 }
  0xb4   :  { %v117_v54 = vadd.f32 %v112_v53, %v79_v52 }
  0xb6   :  { %120 = vst.msk [vmem:[#allocation2] sm:$0xff] %vm19_vm9, %v117_v54 }
  0xbb   :  { %v114_v56 = vpop.f32.mrf.mxu0 }
  0xbc   :  { %v118_v57 = vadd.f32 %v114_v56, %v80_v55 }
  0xbd   :  { %v125_v58 = vld [vmem:[#allocation2] sm:$0xff] }
  0xbe   :  { %v127_v59 = vpack.c.bf16 %v125_v58, %v125_v58  ;;  %121 = vst.msk [vmem:[#allocation2 + $0x8] sm:$0xff] %vm19_vm9, %v118_v57 }
  0xc0   :  { %130 = vst.msk [vmem:[%s257_s3] sm:$0xf] %vm129_vm14, %v127_v59 }
  0xc5   :  { %v126_v60 = vld [vmem:[#allocation2 + $0x8] sm:$0xff] }
  0xc6   :  { %v128_v61 = vpack.c.bf16 %v126_v60, %v126_v60 }
  0xc8   :  { %131 = vst.msk [vmem:[%s257_s3 + $0x4] sm:$0xf] %vm129_vm14, %v128_v61 }

// kernel: attention_forward.5
= control target key start
LH: loop header
LB: loop body
LE: loop exit
PB: predicated region body
PF: predicated region fallthrough
CT: control target
= control target key end

     0   :  { %vm26_vm0 = vcmask 261120   ;;  %v154_v6 = vmov 0.0   ;;  %s233_s0 = inlined_call_operand.vmem [shape: bf16[16,32], index: 0, kind: input, shape index: {}]   ;;  %s234_s1 = inlined_call_operand.vmem [shape: f32[32,32], index: 1, kind: input, shape index: {}]   ;;  %s235_s2 = inlined_call_operand.vmem [shape: f32[32,32], index: 2, kind: input, shape index: {}]   ;;  %s236_s3 = inlined_call_operand.vmem [shape: f32[1,32], index: 3, kind: input, shape index: {}]   ;;  %s237_s4 = inlined_call_operand.vmem [shape: f32[1,32], index: 4, kind: input, shape index: {}]   ;;  %s238_s5 = inlined_call_operand.hbm [shape: f32[16,32], index: 5, kind: output, shape index: {}]  }
   0x1   :  { %v31_v0 = vld [vmem:[%s235_s2 + $0x10] sm:$0xff]  ;;  %v32_v1 = vld [vmem:[%s235_s2 + $0x18] sm:$0xff]  ;;  %v29_v4 = vld [vmem:[%s235_s2] sm:$0xff]  ;;  %27 = vst.msk [vmem:[#allocation2] sm:$0xff] %vm26_vm0, %v154_v6 }
   0x2   :  { %v39_v2 = vld [vmem:[%s234_s1 + $0x10] sm:$0xff]  ;;  %vm35_vm1 = vcmp.gt.f32.partialorder %v31_v0, 0.0  ;;  %vm36_vm2 = vcmp.gt.f32.partialorder %v32_v1, 0.0  ;;  %v40_v3 = vld [vmem:[%s234_s1 + $0x18] sm:$0xff]  ;;  %v30_v5 = vld [vmem:[%s235_s2 + $0x8] sm:$0xff]  ;;  %vm33_vm3 = vcmp.gt.f32.partialorder %v29_v4, 0.0 }
   0x3   :  { %v43_v7 = vsel %vm35_vm1, %v39_v2, 0.0  ;;  %v44_v8 = vsel %vm36_vm2, %v40_v3, 0.0  ;;  %vm34_vm4 = vcmp.gt.f32.partialorder %v30_v5, 0.0  ;;  %v37_v9 = vld [vmem:[%s234_s1] sm:$0xff]  ;;  %v38_v10 = vld [vmem:[%s234_s1 + $0x8] sm:$0xff]  ;;  %28 = vst.msk [vmem:[#allocation2 + $0x8] sm:$0xff] %vm26_vm0, %v154_v6 }
   0x4   :  { %v46_v11 = vpack.c.bf16 %v44_v8, %v43_v7 }
   0x5   :  { %10 = vsyncpa [#allocation4], 0  ;;  %v41_v12 = vsel %vm33_vm3, %v37_v9, 0.0  ;;  %v42_v13 = vsel %vm34_vm4, %v38_v10, 0.0  ;;  %v123_v17 = vld [vmem:[%s233_s0] sm:$0xff]  ;;  %s155_s0 = smov [#allocation3]  }
   0x6   :  { %v64_v14 = vsel %vm26_vm0, %v46_v11, 0  ;;  %v45_v15 = vpack.c.bf16 %v42_v13, %v41_v12  ;;  %v87_v19 = vld [vmem:[%s237_s4] sm:$0x1]  ;;  %s104_s4 = sshll.u32 %s155_s0, 4  ;;  %s106_s15 = sshll.u32 %s238_s5, 4  ;;  %s105_s4 = int_to_ptr.vmem [resolvable:$true] %s104_s4  ;;  %s107_s15 = int_to_ptr.hbm [resolvable:$true] %s106_s15 }
   0x7   :  { %72 = vmatpush.bf16.xpose.msra.mxu0 %v64_v14  ;;  %vm88_vm5 = vcmp.gt.f32.partialorder %v87_v19, 0.0  ;;  %v89_v22 = vld [vmem:[%s236_s3] sm:$0x1]  ;;  %s156_s3 = smov 128   ;;  %s157_s16 = smov 8  }
   0x8   :  { %v61_v16 = vsel %vm26_vm0, %v45_v15, 0  ;;  %v49_v18 = vld [vmem:[#allocation2] sm:$0xff]  ;;  %v90_v23 = vsel %vm88_vm5, %v89_v22, 0.0 }
   0x9   :  { %v94_v25 = vperm.slane %v90_v23, 0 }
   0xa   :  { %v50_v24 = vld [vmem:[#allocation2 + $0x8] sm:$0xff] }
   0xf   :  { %73 = vmatpush.bf16.xpose.msra.mxu0 %v61_v16 }
  0x16   :  { %122 = vmatmul.msk.bf16.vlgmr.msra.gmra.mxu0 %vm26_vm0, %v123_v17 }
  0x93   :  { %v75_v20 = vpop.f32.mrf.mxu0 }
  0x94   :  { %v80_v21 = vadd.f32 %v75_v20, %v49_v18 }
  0x96   :  { %82 = vst.msk [vmem:[#allocation2] sm:$0xff] %vm26_vm0, %v80_v21 }
  0x9b   :  { %v77_v26 = vpop.f32.mrf.mxu0 }
  0x9c   :  { %v81_v27 = vadd.f32 %v77_v26, %v50_v24 }
  0x9d   :  { %v91_v28 = vld [vmem:[#allocation2] sm:$0xff] }
  0x9e   :  { %83 = vst.msk [vmem:[#allocation2 + $0x8] sm:$0xff] %vm26_vm0, %v81_v27  ;;  %v96_v29 = vadd.f32 %v94_v25, %v91_v28 }
  0xa0   :  { %98 = vst.msk [vmem:[#allocation3] sm:$0xff] %vm26_vm0, %v96_v29 }
  0xa5   :  { %v92_v30 = vld [vmem:[#allocation2 + $0x8] sm:$0xff] }
  0xa6   :  { %v97_v31 = vadd.f32 %v94_v25, %v92_v30 }
  0xa8   :  { %99 = vst.msk [vmem:[#allocation3 + $0x8] sm:$0xff] %vm26_vm0, %v97_v31 }
  0xa9   :  { %112 = dma.vmem_to_hbm [thread:$0]  %s105_s4, 256, %s107_s15, [#allocation4], %s156_s3, %s156_s3, %s157_s16  }
  0xaa   :  { %152 = dma.done.wait [#allocation4], 256  }
  0xab   :  { %153 = vsyncadd [#allocation4], 4294967040 }
  0xac   :  { %117 = vsyncpa [#allocation4], 1 }

// kernel: attention_forward.4
= control target key start
LH: loop header
LB: loop body
LE: loop exit
PB: predicated region body
PF: predicated region fallthrough
CT: control target
= control target key end

     0   :  { %s811_s6 = smov 0   ;;  %s927_s0 = inlined_call_operand.vmem [shape: bf16[2,8,96], index: 0, kind: input, shape index: {}]   ;;  %s928_s1 = inlined_call_operand.vmem [shape: bf16[2,8,32], index: 1, kind: output, shape index: {}]  }
   0x1 LB: > { %s668_s7 = sadd.s32 4294967295, %s769_s6   ;;  %p672_p0 = scmp.ge.s32.totalorder %s769_s6, 1  ;;  %s769_s6 = sphi %s811_s6, %s11_s6  }
   0x2   : > { %p86_p1 = scmp.lt.s32.totalorder %s769_s6, 3 }
   0x4   : > { %p87_p2 = pnand %p672_p0, %p86_p1 }
   0x5   : > { %p104_p3 = scmp.lt.s32.totalorder (!%p87_p2), %s668_s7, 1  ;;  %s771_s12 = smov (!%p87_p2), 96  }
   0x6   : > { %90 = sbr.rel (%p87_p2) target bundleno = 1214 (0x4be), region = 24  ;;  %s772_s13 = smov (!%p87_p2), 92  }
   0x7   : > { %s773_s14 = smov (!%p87_p2), 124   ;;  %s774_s15 = smov (!%p87_p2), 64  }
   0x8   : > { %s775_s16 = smov (!%p87_p2), 88   ;;  %s776_s17 = smov (!%p87_p2), 84  }
   0x9   : > { %s777_s18 = smov (!%p87_p2), 120   ;;  %s778_s19 = smov (!%p87_p2), 116  }
   0xa   : > { %s779_s20 = smov (!%p87_p2), 80   ;;  %s780_s21 = smov (!%p87_p2), 108  }
   0xb   : > { %s930_s7 = smov (!%p104_p3, %s668_s7), 1  ;;  %vm122_vm0 = vcmask 31744   ;;  %vm142_vm1 = vcmask 64512   ;;  %s781_s22 = smov 76   ;;  %vm160_vm2 = vcmask 1043456   ;;  %vm602_vm3 = vcmask 97280  }
   0xc   : > { %s673_s8 = sshll.u32 %s930_s7, 2  ;;  %s782_s23 = smov 68   ;;  %vm604_vm4 = vcmask 130048   ;;  %vm606_vm5 = vcmask 162816   ;;  %vm608_vm6 = vcmask 195584   ;;  %vm610_vm7 = vcmask 228352  }
   0xd   : > { %s107_s11 = scalar_lea.vmem %s927_s0, %s673_s8  ;;  %s783_s24 = smov 72   ;;  %vm613_vm8 = vcmask 257024  }
   0xe   : > { %v113_v0 = vld [vmem:[%s107_s11] sm:$0xf]  ;;  %s784_s25 = smov 104   ;;  %s785_s26 = smov 112  }
   0xf   : > { %v118_v1 = vunpack.c.l.b16 %v113_v0  ;;  %v114_v3 = vunpack.c.l.bf16 %v113_v0  ;;  %s786_s27 = smov 100   ;;  %s787_s28 = smov 52  }
  0x10   : > { %s788_s29 = smov 56   ;;  %s789_s30 = smov 48  }
  0x11   : > { %v827_v2 = vpack.c.b16 %v118_v1, %v118_v1  ;;  %v115_v4 = vmul.f32 0.17677669, %v114_v3  ;;  %s790_s2 = smov 44   ;;  %s791_s3 = smov 60  }
  0x12   : > { %s792_s4 = smov 40   ;;  %s793_s5 = smov 36  }
  0x13   : > { %120 = vrot.lane.b32.xlu0 %v827_v2, %s771_s12  ;;  %182 = vrot.lane.b32.xlu1 %v827_v2, %s772_s13  ;;  %v116_v5 = vpack.c.bf16 %v115_v4, %v115_v4  ;;  %s794_s9 = smov 12   ;;  %s795_s10 = smov 4  }
  0x14   : > { %s796_s11 = smov 20   ;;  %s797_s12 = smov 8  }
  0x15   : > { %v178_v6 = vunpack.c.l.b16 %v116_v5  ;;  %s798_s13 = smov 16  }
  0x17   : > { %v831_v7 = vpack.c.b16 %v178_v6, %v178_v6 }
  0x19   : > { %180 = vrot.lane.b32.xlu2 %v831_v7, %s773_s14  ;;  %s799_s14 = smov 24  }
  0x21   : > { %155 = vrot.lane.b32.xlu2 %v827_v2, %s774_s15  ;;  %s800_s15 = smov 28  }
  0x29   : > { %238 = vrot.lane.b32.xlu2 %v827_v2, %s775_s16 }
  0x31   : > { %294 = vrot.lane.b32.xlu2 %v827_v2, %s776_s17 }
  0x39   : > { %236 = vrot.lane.b32.xlu2 %v831_v7, %s777_s18  ;;  %s111_s18 = scalar_lea.vmem %s928_s1, %s673_s8 }
  0x41   : > { %292 = vrot.lane.b32.xlu2 %v831_v7, %s778_s19 }
  0x49   : > { %350 = vrot.lane.b32.xlu2 %v827_v2, %s779_s20 }
  0x51   : > { %404 = vrot.lane.b32.xlu2 %v831_v7, %s780_s21 }
  0x59   : > { %462 = vrot.lane.b32.xlu2 %v827_v2, %s783_s24 }
  0x61   : > { %460 = vrot.lane.b32.xlu2 %v831_v7, %s784_s25 }
  0x73   : > { %v181_v12 = vpop.permute.xlu2 %180 }
  0x7b   : > { %v156_v16 = vpop.permute.xlu2 %155 }
  0x7c   : > { %v162_v32 = vsel %vm160_vm2, %v156_v16, 0 }
  0x7d   : > { %171 = vmatpush.bf16.msra.mxu1 %v162_v32 }
  0x83   : > { %v239_v17 = vpop.permute.xlu2 %238 }
  0x84   : > { %v244_v30 = vsel %vm122_vm0, %v239_v17, 0 }
  0x85   : > { %v121_v8 = vpop.permute.xlu0 %120  ;;  %v183_v10 = vpop.permute.xlu1 %182  ;;  %253 = vmatpush.bf16.xpose.msrb.mxu1 %v244_v30 }
  0x86   : > { %v127_v9 = vsel %vm122_vm0, %v121_v8, 0  ;;  %v188_v11 = vsel %vm122_vm0, %v183_v10, 0 }
  0x87   : > { %136 = vmatpush.bf16.xpose.msra.mxu0 %v127_v9  ;;  %197 = vmatpush.bf16.xpose.msra.mxu2 %v188_v11 }
  0x8b   : > { %v295_v18 = vpop.permute.xlu2 %294 }
  0x8c   : > { %v300_v20 = vsel %vm122_vm0, %v295_v18, 0 }
  0x8e   : > { %675 = vmatmul.msk.bf16.vlgmr.msra.gmra.mxu0 %vm122_vm0, %v116_v5  ;;  %677 = vmatmul.msk.bf16.vlgmr.msra.gmra.mxu2 %vm122_vm0, %v181_v12 }
  0x8f   : > { %309 = vmatpush.bf16.xpose.msrb.mxu0 %v300_v20 }
  0x93   : > { %v237_v19 = vpop.permute.xlu2 %236 }
  0x9b   : > { %v293_v21 = vpop.permute.xlu2 %292 }
  0x9e   : > { %681 = vmatmul.msk.bf16.vlgmr.msrb.gmra.mxu0 %vm122_vm0, %v293_v21 }
  0xa3   : > { %v351_v31 = vpop.permute.xlu2 %350 }
  0xa4   : > { %v356_v44 = vsel %vm122_vm0, %v351_v31, 0 }
  0xab   : > { %v405_v35 = vpop.permute.xlu2 %404 }
  0xb3   : > { %v463_v49 = vpop.permute.xlu2 %462 }
  0xb4   : > { %v468_v53 = vsel %vm122_vm0, %v463_v49, 0 }
  0xbb   : > { %v461_v58 = vpop.permute.xlu2 %460 }
 0x10b   : > { %v138_v13 = vpop.f32.mrf.mxu0 }
 0x10c   : > { %v143_v14 = vsel %vm142_vm1, %v138_v13, -inf }
 0x10d   : > { %144 = vmax.xlane.f32.xlu0 %v143_v14 }
 0x111   : > { %v199_v22 = vpop.f32.mrf.mxu2 }
 0x112   : > { %v203_v24 = vsel %vm142_vm1, %v199_v22, -inf }
 0x113   : > { %v140_v15 = vpop.f32.mrf.mxu0 }
 0x119   : > { %v201_v27 = vpop.f32.mrf.mxu2 }
 0x11b   : > { %v311_v36 = vpop.f32.mrf.mxu0 }
 0x11c   : > { %v315_v37 = vsel %vm142_vm1, %v311_v36, -inf }
 0x121   : > { %406 = vrot.lane.b32.xlu0 %v827_v2, %s781_s22 }
 0x123   : > { %v313_v38 = vpop.f32.mrf.mxu0 }
 0x129   : > { %518 = vrot.lane.b32.xlu0 %v827_v2, %s782_s23 }
 0x153   : > { %204 = vmax.xlane.f32.xlu0 %v203_v24 }
 0x180   : > { %v145_v23 = vpop.xlane.xlu0 %144 }
 0x181   : > { %v146_v25 = vsub.f32 %v138_v13, %v145_v23 }
 0x183   : > { %v147_v26 = vmul.f32 1.442695, %v146_v25 }
 0x185   : > { %731 = vpow2.f32 %v147_v26 }
 0x18b   : > { %v732_v28 = vpop.eup %731 }
 0x18c   : > { %v149_v29 = vsel %vm142_vm1, %v732_v28, 0.0 }
 0x18d   : > { %150 = vadd.xlane.f32.xlu1 %v149_v29 }
 0x193   : > { %v407_v33 = vpop.permute.xlu0 %406 }
 0x194   : > { %v412_v34 = vsel %vm122_vm0, %v407_v33, 0 }
 0x195   : > { %421 = vmatpush.bf16.xpose.msra.mxu0 %v412_v34 }
 0x19b   : > { %v519_v39 = vpop.permute.xlu0 %518 }
 0x19c   : > { %685 = vmatmul.msk.bf16.vlgmr.msra.gmra.mxu0 %vm122_vm0, %v405_v35  ;;  %v524_v40 = vsel %vm122_vm0, %v519_v39, 0 }
 0x19d   : > { %533 = vmatpush.bf16.xpose.msrb.mxu0 %v524_v40 }
 0x1a6   : > { %348 = vrot.lane.b32.xlu1 %v831_v7, %s785_s26 }
 0x1ae   : > { %516 = vrot.lane.b32.xlu1 %v831_v7, %s786_s27 }
 0x1c6   : > { %v205_v46 = vpop.xlane.xlu0 %204 }
 0x1c7   : > { %v206_v47 = vsub.f32 %v199_v22, %v205_v46 }
 0x1c9   : > { %v207_v48 = vmul.f32 1.442695, %v206_v47 }
 0x1d8   : > { %316 = vmax.xlane.f32.xlu1 %v315_v37 }
 0x200   : > { %v151_v41 = vpop.xlane.xlu1 %150 }
 0x201   : > { %733 = vrcp.f32 %v151_v41 }
 0x202   : > { %735 = vpow2.f32 %v207_v48 }
 0x207   : > { %v734_v42 = vpop.eup %733 }
 0x208   : > { %v153_v43 = vmul.f32 %v734_v42, %v732_v28  ;;  %v867_v54 = vpop.eup %735 }
 0x209   : > { %v209_v56 = vsel %vm142_vm1, %v867_v54, 0.0 }
 0x20a   : > { %v154_v45 = vpack.c.bf16 %v153_v43, %v153_v43 }
 0x20c   : > { %676 = vmatmul.msk.bf16.vlgmr.msra.gmra.mxu1 %vm142_vm1, %v154_v45 }
 0x20d   : > { %365 = vmatpush.bf16.xpose.msra.mxu1 %v356_v44 }
 0x218   : > { %v349_v50 = vpop.permute.xlu1 %348 }
 0x219   : > { %v423_v51 = vpop.f32.mrf.mxu0 }
 0x21a   : > { %v427_v52 = vsel %vm142_vm1, %v423_v51, -inf }
 0x21b   : > { %428 = vmax.xlane.f32.xlu2 %v427_v52 }
 0x21c   : > { %679 = vmatmul.msk.bf16.vlgmr.msrb.gmra.mxu1 %vm122_vm0, %v237_v19 }
 0x21d   : > { %477 = vmatpush.bf16.xpose.msrb.mxu1 %v468_v53 }
 0x220   : > { %v517_v55 = vpop.permute.xlu1 %516 }
 0x221   : > { %689 = vmatmul.msk.bf16.vlgmr.msrb.gmra.mxu0 %vm122_vm0, %v517_v55  ;;  %v425_v57 = vpop.f32.mrf.mxu0 }
 0x223   : > { %210 = vadd.xlane.f32.xlu2 %v209_v56 }
 0x22c   : > { %683 = vmatmul.msk.bf16.vlgmr.msra.gmra.mxu1 %vm122_vm0, %v349_v50 }
 0x23c   : > { %687 = vmatmul.msk.bf16.vlgmr.msrb.gmra.mxu1 %vm122_vm0, %v461_v58 }
 0x24b   : > { %v317_v60 = vpop.xlane.xlu1 %316 }
 0x24c   : > { %v318_v61 = vsub.f32 %v311_v36, %v317_v60 }
 0x24e   : > { %v319_v63 = vmul.f32 1.442695, %v318_v61 }
 0x250   : > { %737 = vpow2.f32 %v319_v63 }
 0x256   : > { %v738_v4 = vpop.eup %737 }
 0x257   : > { %v321_v7 = vsel %vm142_vm1, %v738_v4, 0.0 }
 0x289   : > { %v874_v59 = vpop.f32.mrf.mxu1 }
 0x28e   : > { %v429_v15 = vpop.xlane.xlu2 %428 }
 0x28f   : > { %v430_v16 = vsub.f32 %v423_v51, %v429_v15 }
 0x291   : > { %v175_v62 = vpop.f32.mrf.mxu1  ;;  %v431_v17 = vmul.f32 1.442695, %v430_v16 }
 0x293   : > { %739 = vpow2.f32 %v431_v17 }
 0x296   : > { %v211_v20 = vpop.xlane.xlu2 %210 }
 0x299   : > { %v255_v0 = vpop.f32.mrf.mxu1  ;;  %v886_v18 = vpop.eup %739 }
 0x29a   : > { %v259_v1 = vsel %vm142_vm1, %v255_v0, -inf  ;;  %v433_v19 = vsel %vm142_vm1, %v886_v18, 0.0 }
 0x29b   : > { %260 = vmax.xlane.f32.xlu2 %v259_v1 }
 0x29e   : > { %v535_v3 = vpop.f32.mrf.mxu0 }
 0x29f   : > { %v539_v5 = vsel %vm142_vm1, %v535_v3, -inf }
 0x2a0   : > { %540 = vmax.xlane.f32.xlu0 %v539_v5 }
 0x2a1   : > { %v257_v6 = vpop.f32.mrf.mxu1 }
 0x2a3   : > { %322 = vadd.xlane.f32.xlu2 %v321_v7 }
 0x2a6   : > { %v537_v8 = vpop.f32.mrf.mxu0 }
 0x2a9   : > { %v367_v9 = vpop.f32.mrf.mxu1 }
 0x2aa   : > { %v371_v10 = vsel %vm142_vm1, %v367_v9, -inf }
 0x2ab   : > { %372 = vmax.xlane.f32.xlu0 %v371_v10 }
 0x2b1   : > { %v369_v11 = vpop.f32.mrf.mxu1 }
 0x2b9   : > { %v479_v12 = vpop.f32.mrf.mxu1 }
 0x2ba   : > { %v483_v13 = vsel %vm142_vm1, %v479_v12, -inf }
 0x2bb   : > { %484 = vmax.xlane.f32.xlu1 %v483_v13  ;;  %327 = vrot.lane.b32.xlu2 %v827_v2, %s787_s28 }
 0x2bf   : > { %271 = vrot.lane.b32.xlu0 %v827_v2, %s788_s29 }
 0x2c1   : > { %v481_v14 = vpop.f32.mrf.mxu1 }
 0x2c3   : > { %383 = vrot.lane.b32.xlu2 %v827_v2, %s789_s30 }
 0x2cb   : > { %439 = vrot.lane.b32.xlu2 %v827_v2, %s790_s2 }
 0x2d4   : > { %215 = vrot.lane.b32.xlu1 %v827_v2, %s791_s3 }
 0x2e9   : > { %434 = vadd.xlane.f32.xlu0 %v433_v19 }
 0x30e   : > { %v261_v21 = vpop.xlane.xlu2 %260 }
 0x30f   : > { %v262_v22 = vsub.f32 %v255_v0, %v261_v21 }
 0x311   : > { %v263_v23 = vmul.f32 1.442695, %v262_v22 }
 0x313   : > { %741 = vpow2.f32 %v263_v23  ;;  %v541_v24 = vpop.xlane.xlu0 %540 }
 0x314   : > { %v542_v35 = vsub.f32 %v535_v3, %v541_v24 }
 0x316   : > { %v323_v25 = vpop.xlane.xlu2 %322  ;;  %v543_v37 = vmul.f32 1.442695, %v542_v35 }
 0x317   : > { %743 = vrcp.f32 %v323_v25 }
 0x319   : > { %v742_v26 = vpop.eup %741 }
 0x31a   : > { %v265_v27 = vsel %vm142_vm1, %v742_v26, 0.0 }
 0x31b   : > { %266 = vadd.xlane.f32.xlu0 %v265_v27 }
 0x31d   : > { %v744_v28 = vpop.eup %743 }
 0x31e   : > { %v325_v29 = vmul.f32 %v744_v28, %v738_v4  ;;  %v328_v30 = vpop.permute.xlu2 %327  ;;  %v373_v31 = vpop.xlane.xlu0 %372 }
 0x31f   : > { %v374_v32 = vsub.f32 %v367_v9, %v373_v31  ;;  %v333_v33 = vsel %vm160_vm2, %v328_v30, 0 }
 0x320   : > { %342 = vmatpush.bf16.msrb.mxu2 %v333_v33  ;;  %v326_v34 = vpack.c.bf16 %v325_v29, %v325_v29 }
 0x321   : > { %v375_v36 = vmul.f32 1.442695, %v374_v32 }
 0x323   : > { %745 = vpow2.f32 %v375_v36  ;;  %682 = vmatmul.msk.bf16.vlgmr.msrb.gmra.mxu2 %vm142_vm1, %v326_v34 }
 0x324   : > { %747 = vpow2.f32 %v543_v37 }
 0x326   : > { %v384_v46 = vpop.permute.xlu2 %383 }
 0x327   : > { %v389_v58 = vsel %vm160_vm2, %v384_v46, 0 }
 0x329   : > { %v746_v38 = vpop.eup %745 }
 0x32a   : > { %v377_v39 = vsel %vm142_vm1, %v746_v38, 0.0  ;;  %v894_v41 = vpop.eup %747 }
 0x32b   : > { %378 = vadd.xlane.f32.xlu1 %v377_v39  ;;  %v545_v44 = vsel %vm142_vm1, %v894_v41, 0.0 }
 0x32e   : > { %v485_v40 = vpop.xlane.xlu1 %484  ;;  %v440_v49 = vpop.permute.xlu2 %439 }
 0x32f   : > { %v486_v42 = vsub.f32 %v479_v12, %v485_v40  ;;  %495 = vrot.lane.b32.xlu0 %v827_v2, %s792_s4  ;;  %v445_v50 = vsel %vm160_vm2, %v440_v49, 0 }
 0x330   : > { %454 = vmatpush.bf16.msra.mxu2 %v445_v50 }
 0x331   : > { %v487_v43 = vmul.f32 1.442695, %v486_v42  ;;  %v272_v52 = vpop.permute.xlu0 %271 }
 0x332   : > { %v277_v55 = vsel %vm160_vm2, %v272_v52, 0 }
 0x333   : > { %749 = vpow2.f32 %v487_v43  ;;  %546 = vadd.xlane.f32.xlu1 %v545_v44 }
 0x334   : > { %751 = vrcp.f32 %v211_v20 }
 0x339   : > { %v750_v45 = vpop.eup %749 }
 0x33a   : > { %v489_v47 = vsel %vm142_vm1, %v750_v45, 0.0  ;;  %v752_v48 = vpop.eup %751 }
 0x33b   : > { %490 = vadd.xlane.f32.xlu2 %v489_v47  ;;  %v213_v51 = vmul.f32 %v752_v48, %v867_v54 }
 0x33d   : > { %v214_v57 = vpack.c.bf16 %v213_v51, %v213_v51 }
 0x346   : > { %v216_v53 = vpop.permute.xlu1 %215 }
 0x347   : > { %v221_v56 = vsel %vm160_vm2, %v216_v53, 0 }
 0x348   : > { %230 = vmatpush.bf16.msra.mxu3 %v221_v56 }
 0x34b   : > { %678 = vmatmul.msk.bf16.vlgmr.msra.gmra.mxu3 %vm142_vm1, %v214_v57 }
 0x34c   : > { %286 = vmatpush.bf16.msrb.mxu3 %v277_v55  ;;  %551 = vrot.lane.b32.xlu1 %v827_v2, %s793_s5 }
 0x350   : > { %398 = vmatpush.bf16.msra.mxu3 %v389_v58 }
 0x35c   : > { %v435_v60 = vpop.xlane.xlu0 %434 }
 0x35d   : > { %753 = vrcp.f32 %v435_v60 }
 0x363   : > { %v754_v54 = vpop.eup %753 }
 0x364   : > { %v437_v61 = vmul.f32 %v754_v54, %v886_v18 }
 0x366   : > { %v438_v62 = vpack.c.bf16 %v437_v61, %v437_v61 }
 0x368   : > { %686 = vmatmul.msk.bf16.vlgmr.msra.gmra.mxu2 %vm142_vm1, %v438_v62 }
 0x38e   : > { %v267_v63 = vpop.xlane.xlu0 %266 }
 0x38f   : > { %755 = vrcp.f32 %v267_v63 }
 0x395   : > { %v756_v0 = vpop.eup %755 }
 0x396   : > { %v269_v1 = vmul.f32 %v756_v0, %v742_v26 }
 0x398   : > { %v270_v3 = vpack.c.bf16 %v269_v1, %v269_v1 }
 0x39a   : > { %680 = vmatmul.msk.bf16.vlgmr.msrb.gmra.mxu3 %vm142_vm1, %v270_v3 }
 0x39e   : > { %v379_v4 = vpop.xlane.xlu1 %378 }
 0x39f   : > { %757 = vrcp.f32 %v379_v4 }
 0x3a1   : > { %v496_v5 = vpop.permute.xlu0 %495 }
 0x3a2   : > { %v501_v2 = vsel %vm160_vm2, %v496_v5, 0 }
 0x3a3   : > { %510 = vmatpush.bf16.msrb.mxu3 %v501_v2 }
 0x3a5   : > { %v758_v6 = vpop.eup %757 }
 0x3a6   : > { %v381_v7 = vmul.f32 %v758_v6, %v746_v38  ;;  %v344_v8 = vpop.f32.mrf.mxu2  ;;  %v547_v12 = vpop.xlane.xlu1 %546 }
 0x3a7   : > { %581 = vrot.lane.b32.xlu1 %v344_v8, %s794_s9 }
 0x3a8   : > { %v382_v9 = vpack.c.bf16 %v381_v7, %v381_v7 }
 0x3aa   : > { %684 = vmatmul.msk.bf16.vlgmr.msra.gmra.mxu3 %vm142_vm1, %v382_v9 }
 0x3ae   : > { %v346_v10 = vpop.f32.mrf.mxu2  ;;  %v491_v11 = vpop.xlane.xlu2 %490 }
 0x3af   : > { %759 = vrcp.f32 %v491_v11 }
 0x3b0   : > { %761 = vrcp.f32 %v547_v12 }
 0x3b5   : > { %v760_v13 = vpop.eup %759 }
 0x3b6   : > { %v493_v14 = vmul.f32 %v760_v13, %v750_v45  ;;  %v762_v16 = vpop.eup %761 }
 0x3b7   : > { %v549_v17 = vmul.f32 %v762_v16, %v894_v41 }
 0x3b8   : > { %v494_v15 = vpack.c.bf16 %v493_v14, %v493_v14 }
 0x3b9   : > { %v550_v20 = vpack.c.bf16 %v549_v17, %v549_v17 }
 0x3ba   : > { %688 = vmatmul.msk.bf16.vlgmr.msrb.gmra.mxu3 %vm142_vm1, %v494_v15 }
 0x3be   : > { %v552_v18 = vpop.permute.xlu1 %551 }
 0x3bf   : > { %v557_v19 = vsel %vm160_vm2, %v552_v18, 0 }
 0x3c0   : > { %566 = vmatpush.bf16.msrb.mxu2 %v557_v19 }
 0x3c3   : > { %690 = vmatmul.msk.bf16.vlgmr.msrb.gmra.mxu2 %vm142_vm1, %v550_v20 }
 0x3ce   : > { %v232_v21 = vpop.f32.mrf.mxu3 }
 0x3cf   : > { %573 = vrot.lane.b32.xlu0 %v232_v21, %s795_s10 }
 0x3d6   : > { %v234_v22 = vpop.f32.mrf.mxu3 }
 0x3eb   : > { %v456_v23 = vpop.f32.mrf.mxu2 }
 0x3ec   : > { %589 = vrot.lane.b32.xlu1 %v456_v23, %s796_s11 }
 0x3f3   : > { %v458_v24 = vpop.f32.mrf.mxu2 }
 0x419   : > { %v582_v34 = vpop.permute.xlu1 %581 }
 0x41d   : > { %v288_v25 = vpop.f32.mrf.mxu3 }
 0x41e   : > { %577 = vrot.lane.b32.xlu2 %v288_v25, %s797_s12 }
 0x425   : > { %v290_v26 = vpop.f32.mrf.mxu3 }
 0x42d   : > { %v400_v27 = vpop.f32.mrf.mxu3 }
 0x42e   : > { %585 = vrot.lane.b32.xlu0 %v400_v27, %s798_s13 }
 0x435   : > { %v402_v28 = vpop.f32.mrf.mxu3 }
 0x43d   : > { %v512_v29 = vpop.f32.mrf.mxu3 }
 0x43e   : > { %593 = vrot.lane.b32.xlu0 %v512_v29, %s799_s14 }
 0x441   : > { %v574_v33 = vpop.permute.xlu0 %573 }
 0x442   : > { %v600_v37 = vsel %vm122_vm0, %v874_v59, %v574_v33 }
 0x445   : > { %v514_v30 = vpop.f32.mrf.mxu3 }
 0x446   : > { %v568_v31 = vpop.f32.mrf.mxu2 }
 0x447   : > { %597 = vrot.lane.b32.xlu1 %v568_v31, %s800_s15 }
 0x44e   : > { %v570_v32 = vpop.f32.mrf.mxu2 }
 0x45e   : > { %v590_v38 = vpop.permute.xlu1 %589 }
 0x478   : > { %v578_v35 = vpop.permute.xlu2 %577 }
 0x479   : > { %v601_v39 = vsel %vm142_vm1, %v600_v37, %v578_v35 }
 0x47a   : > { %v603_v40 = vsel %vm602_vm3, %v601_v39, %v582_v34 }
 0x4a0   : > { %v586_v36 = vpop.permute.xlu0 %585 }
 0x4a1   : > { %v605_v41 = vsel %vm604_vm4, %v603_v40, %v586_v36 }
 0x4a2   : > { %v607_v43 = vsel %vm606_vm5, %v605_v41, %v590_v38 }
 0x4b0   : > { %v594_v42 = vpop.permute.xlu0 %593 }
 0x4b1   : > { %v609_v44 = vsel %vm608_vm6, %v607_v43, %v594_v42 }
 0x4b9   : > { %v598_v45 = vpop.permute.xlu1 %597 }
 0x4ba   : > { %v611_v59 = vsel %vm610_vm7, %v609_v44, %v598_v45 }
 0x4bb   : > { %v612_v46 = vpack.c.bf16 %v611_v59, %v611_v59 }
 0x4bd   : > { %614 = vst.msk [vmem:[%s111_s18] sm:$0xf] %vm613_vm8, %v612_v46 }
 0x4be PF: > { %s11_s6 = sadd.s32 1, %s769_s6  }
 0x4bf   : > { %p8_p4 = scmp.ge.s32.totalorder %s11_s6, 4  }
 0x4c1   :  { %10 = sbr.rel (!%p8_p4) target bundleno = 1 (0x1), region = 54 }

</bundles_post_ra>
